<compile_context>
chip_gen: v7x
topology: tpu7x:2x2x1
jax: 0.10.0
libtpu: 0.0.40
codegen_flags: <defaults>
</compile_context>

<pallas_src>
import numpy as np

import jax
import jax.numpy as jnp
from jax.experimental import pallas as pl
from jax.experimental.pallas import tpu as pltpu

# ----------------------------- model dims (small, synthetic) -----------------
B = 2          # batch
L = 8          # sequence length
D_MODEL = 32
D_INNER = 64
N_HEAD = 4
D_K = 8
D_V = 8
LN_EPS = 1e-5  # torch.nn.LayerNorm default

HDK = N_HEAD * D_K      # 32
QK_COLS = 2 * HDK       # 64   [Wq | Wk]

# ---- packed-weight layout: ONE (136, 128) bf16 slab (~34 KiB), 8-aligned row bands ----
PACK_W = 128
R_WQK = 0               # (32, 64)   [Wq*scale | Wk]
R_WVP = 32              # (32, 128)  folded Wv@Wfc, head h in lanes h*32:(h+1)*32
R_W1 = 64               # (32, 64)   FFN W1
R_W2 = 96               # (32, 64)   W2[:32,:] in lanes 0:32, W2[32:,:] in lanes 32:64
R_VEC = 128             # 8 rows, one vector per row:
V_BQK, V_BOUT, V_LN1G, V_LN1B, V_B1, V_B2, V_LN2G, V_LN2B = range(8)
PACK_ROWS = 136


def _layer_norm(x, gamma, beta):
    # biased variance over last dim, like torch.nn.LayerNorm
    mean = jnp.mean(x, axis=-1, keepdims=True)
    var = jnp.mean((x - mean) ** 2, axis=-1, keepdims=True)
    inv = jax.lax.rsqrt(var + LN_EPS)
    return (x - mean) * inv * gamma + beta


# ----------------------------- Pallas kernel ---------------------------------
def encoder_layer_kernel(x_ref, npm_ref, amask_ref, w_ref, out_ref, attn_ref):
    BB = amask_ref.shape[0]              # batch elements handled by this grid step

    x = x_ref[...]                       # (BB*L, D) f32, token-major
    npm = npm_ref[...]                   # (BB*L, 1) f32
    xb = x.astype(jnp.bfloat16)          # bf16 operand for MXU matmuls

    # ---- fused Q/K projection (1/sqrt(d_k) folded into Wq/bq) and folded V' = x @ (Wv@Wfc) --
    wqk = w_ref[R_WQK:R_WQK + D_MODEL, 0:QK_COLS]                               # (32, 64) bf16
    bqk = w_ref[R_VEC + V_BQK:R_VEC + V_BQK + 1, 0:QK_COLS].astype(jnp.float32)
    qk = jnp.dot(xb, wqk, preferred_element_type=jnp.float32) + bqk             # (BB*L, 64)

    wvp = w_ref[R_WVP:R_WVP + D_MODEL, 0:N_HEAD * D_MODEL]                      # (32, 128) bf16
    vh = jnp.dot(xb, wvp, preferred_element_type=jnp.float32)                   # (BB*L, 128)

    # ---- head-major stacking (index = h*BB + b) via cheap 2-D slices + leading concat ----
    def stack_heads(mat, col0, width):
        parts = [mat[b * L:(b + 1) * L, col0 + h * width: col0 + (h + 1) * width][None]
                 for h in range(N_HEAD) for b in range(BB)]
        return jnp.concatenate(parts, axis=0)                  # (H*BB, L, width)

    q = stack_heads(qk, 0, D_K)                                # (H*BB, L, 8)
    k = stack_heads(qk, HDK, D_K)                              # (H*BB, L, 8)
    v = stack_heads(vh, 0, D_MODEL)                            # (H*BB, L, 32)  (Wfc folded)

    # ---- scores + additive mask bias (broadcast over heads, no replicated copies) ----
    s = jnp.einsum('bqd,bkd->bqk', q, k, preferred_element_type=jnp.float32)    # (H*BB, L, L)
    bias = jnp.where(amask_ref[...] != 0, jnp.float32(-1e30), jnp.float32(0.0)) # (BB, L, L)
    s4 = s.reshape(N_HEAD, BB, L, L) + bias[None]              # outer split + broadcast add

    m = jnp.max(s4, axis=-1, keepdims=True)
    e = jnp.exp(s4 - m)
    p4 = e * pl.reciprocal(jnp.sum(e, axis=-1, keepdims=True), approx=True)
    p = p4.reshape(N_HEAD * BB, L, L)                          # outer merge (free)
    attn_ref[...] = p                                          # (H*BB, L, L), no reshape

    # ---- context; Wfc already folded into V', so just sum heads per batch element ----
    ctx = jnp.einsum('bqk,bkd->bqd', p, v, preferred_element_type=jnp.float32)  # (H*BB, L, 32)
    tok = jnp.concatenate(
        [sum(ctx[h * BB + b] for h in range(N_HEAD)) for b in range(BB)], axis=0)  # (BB*L, 32)
    bout = w_ref[R_VEC + V_BOUT:R_VEC + V_BOUT + 1, 0:D_MODEL].astype(jnp.float32)
    proj = tok + bout                                          # == ctx2 @ Wfc + bfc
    # TODO(synk): nn.Dropout layers are identity here (eval/inference mode).

    y = _layer_norm(proj + x,
                    w_ref[R_VEC + V_LN1G:R_VEC + V_LN1G + 1, 0:D_MODEL].astype(jnp.float32),
                    w_ref[R_VEC + V_LN1B:R_VEC + V_LN1B + 1, 0:D_MODEL].astype(jnp.float32))
    y = y * npm                                                # enc_output *= non_pad_mask

    # ---- position-wise FFN (Conv1d k=1 == pointwise matmul), W2 as two lane-halves ----
    yb = y.astype(jnp.bfloat16)
    w1 = w_ref[R_W1:R_W1 + D_MODEL, 0:D_INNER]                                   # (32, 64)
    b1 = w_ref[R_VEC + V_B1:R_VEC + V_B1 + 1, 0:D_INNER].astype(jnp.float32)
    h1 = jnp.maximum(jnp.dot(yb, w1, preferred_element_type=jnp.float32) + b1, 0.0)
    h1b = h1.astype(jnp.bfloat16)

    half = D_INNER // 2
    w2a = w_ref[R_W2:R_W2 + half, 0:D_MODEL]                                     # W2[:32, :]
    w2b = w_ref[R_W2:R_W2 + half, D_MODEL:2 * D_MODEL]                           # W2[32:, :]
    b2 = w_ref[R_VEC + V_B2:R_VEC + V_B2 + 1, 0:D_MODEL].astype(jnp.float32)
    h2 = (jnp.dot(h1b[:, 0:half], w2a, preferred_element_type=jnp.float32)
          + jnp.dot(h1b[:, half:D_INNER], w2b, preferred_element_type=jnp.float32)
          + b2)

    z = _layer_norm(h2 + y,
                    w_ref[R_VEC + V_LN2G:R_VEC + V_LN2G + 1, 0:D_MODEL].astype(jnp.float32),
                    w_ref[R_VEC + V_LN2B:R_VEC + V_LN2B + 1, 0:D_MODEL].astype(jnp.float32))
    out_ref[...] = (z * npm).astype(out_ref.dtype)             # enc_output *= non_pad_mask


# ----------------------------- parameter packing -------------------------------
def pack_params(params):
    """Pack all weights/biases into one (136, 128) bf16 slab.

    Folds 1/sqrt(d_k) into Wq/bq, folds Wfc into Wv (per head) and bv into the output bias,
    and stores W2 as two 32-row halves side by side in lanes.
    """
    (wq, bq, wk, bk, wv, bv, wfc, bfc, g1, be1, w1, b1, w2, b2, g2, be2) = [
        np.asarray(p, np.float32) for p in params]
    scale = np.float32(1.0 / np.sqrt(D_K))

    pack = np.zeros((PACK_ROWS, PACK_W), np.float32)

    def put(row, col, a):
        pack[row:row + a.shape[0], col:col + a.shape[1]] = a

    put(R_WQK, 0, np.concatenate([wq * scale, wk], axis=1))              # (32, 64)
    wvp = np.concatenate(
        [wv[:, h * D_V:(h + 1) * D_V] @ wfc[h * D_V:(h + 1) * D_V, :]
         for h in range(N_HEAD)], axis=1)                                # (32, 128)
    put(R_WVP, 0, wvp)
    put(R_W1, 0, w1)                                                     # (32, 64)
    put(R_W2, 0, w2[:D_INNER // 2, :])                                   # (32, 32)
    put(R_W2, D_MODEL, w2[D_INNER // 2:, :])                             # (32, 32)
    put(R_VEC + V_BQK, 0, np.concatenate([bq * scale, bk], axis=1))      # (1, 64)
    put(R_VEC + V_BOUT, 0, bfc + bv @ wfc)                               # (1, 32)
    put(R_VEC + V_LN1G, 0, g1)
    put(R_VEC + V_LN1B, 0, be1)
    put(R_VEC + V_B1, 0, b1)                                             # (1, 64)
    put(R_VEC + V_B2, 0, b2)
    put(R_VEC + V_LN2G, 0, g2)
    put(R_VEC + V_LN2B, 0, be2)
    return jnp.asarray(pack, dtype=jnp.bfloat16)


# ----------------------------- wrapper ------------------------------------------
def encoder_layer(enc_input, non_pad_mask, slf_attn_mask, packed_w, batch_block=None):
    Bsz, Ls, D = enc_input.shape
    assert (Ls, D) == (L, D_MODEL)
    # DMA/latency-bound at this size: fuse the whole batch into ONE grid step on every
    # generation (v5e/v6e/v7x).  Only split the batch across cores (batch_block < Bsz) once
    # per-step compute reaches >=256 token rows, and re-derive tiles / set
    # pltpu.CompilerParams(vmem_limit_bytes=...) for the 64 MiB v7x VMEM ceiling when the
    # O(H*BB*L^2) score tensors grow.
    BB = batch_block if batch_block is not None else Bsz
    if Bsz % BB != 0:
        BB = Bsz
    n_blocks = Bsz // BB

    # Token-major 2-D views (free reshapes outside the kernel).
    x2 = enc_input.reshape(Bsz * L, D_MODEL).astype(jnp.float32)
    npm2 = non_pad_mask.reshape(Bsz * L, 1).astype(jnp.float32)
    amask = slf_attn_mask.astype(jnp.int32)

    in_specs = [
        pl.BlockSpec((BB * L, D_MODEL), lambda i: (i, 0)),        # enc_input (token-major)
        pl.BlockSpec((BB * L, 1), lambda i: (i, 0)),              # non_pad_mask
        pl.BlockSpec((BB, L, L), lambda i: (i, 0, 0)),            # slf_attn_mask
        pl.BlockSpec((PACK_ROWS, PACK_W), lambda i: (0, 0)),      # single packed bf16 slab
    ]
    out_specs = (
        pl.BlockSpec((BB * L, D_MODEL), lambda i: (i, 0)),        # enc_output (token-major)
        pl.BlockSpec((N_HEAD * BB, L, L), lambda i: (i, 0, 0)),   # attn maps, head-major
    )
    out_shape = (
        jax.ShapeDtypeStruct((Bsz * L, D_MODEL), jnp.float32),
        jax.ShapeDtypeStruct((N_HEAD * Bsz, L, L), jnp.float32),
    )

    enc_out2, attn = pl.pallas_call(
        encoder_layer_kernel,
        grid=(n_blocks,),
        in_specs=in_specs,
        out_specs=out_specs,
        out_shape=out_shape,
        compiler_params=pltpu.CompilerParams(dimension_semantics=("parallel",)),
    )(x2, npm2, amask, packed_w)

    enc_out = enc_out2.reshape(Bsz, L, D_MODEL)
    if n_blocks > 1:
        # per-block head-major order -> global head-major (n_head*B, L, L); cheap XLA reorder.
        attn = (attn.reshape(n_blocks, N_HEAD, BB, L, L)
                    .transpose(1, 0, 2, 3, 4)
                    .reshape(N_HEAD * Bsz, L, L))
    return enc_out, attn


# ----------------------------- pure-JAX f32 reference --------------------------
def encoder_layer_ref(x, npm, amask, params):
    (wq, bq, wk, bk, wv, bv, wfc, bfc, g1, be1, w1, b1, w2, b2, g2, be2) = params
    Bsz = x.shape[0]
    q = (x @ wq + bq).reshape(Bsz, L, N_HEAD, D_K).transpose(2, 0, 1, 3)
    k = (x @ wk + bk).reshape(Bsz, L, N_HEAD, D_K).transpose(2, 0, 1, 3)
    v = (x @ wv + bv).reshape(Bsz, L, N_HEAD, D_V).transpose(2, 0, 1, 3)
    s = jnp.einsum('hbqd,hbkd->hbqk', q, k) / np.sqrt(D_K)
    s = jnp.where(amask[None] != 0, -jnp.inf, s)
    attn = jax.nn.softmax(s, axis=-1)
    o = jnp.einsum('hbqk,hbkd->hbqd', attn, v).transpose(1, 2, 0, 3).reshape(Bsz, L, N_HEAD * D_V)
    y = _layer_norm(o @ wfc + bfc + x, g1, be1) * npm
    h = jnp.maximum(y @ w1 + b1, 0.0)
    z = _layer_norm(h @ w2 + b2 + y, g2, be2) * npm
    return z, attn.reshape(N_HEAD * Bsz, L, L)


# ----------------------------- main --------------------------------------------
if __name__ == "__main__":
    key = jax.random.PRNGKey(0)
    ks = jax.random.split(key, 12)

    def init(k, shape, scale=0.05):
        return (scale * jax.random.normal(k, shape)).astype(jnp.float32)

    params = (
        init(ks[0], (D_MODEL, N_HEAD * D_K)), init(ks[1], (1, N_HEAD * D_K)),   # Wq, bq
        init(ks[2], (D_MODEL, N_HEAD * D_K)), init(ks[3], (1, N_HEAD * D_K)),   # Wk, bk
        init(ks[4], (D_MODEL, N_HEAD * D_V)), init(ks[5], (1, N_HEAD * D_V)),   # Wv, bv
        init(ks[6], (N_HEAD * D_V, D_MODEL)), init(ks[7], (1, D_MODEL)),        # Wfc, bfc
        jnp.ones((1, D_MODEL), jnp.float32), jnp.zeros((1, D_MODEL), jnp.float32),  # LN1
        init(ks[8], (D_MODEL, D_INNER)), init(ks[9], (1, D_INNER)),             # W1, b1
        init(ks[10], (D_INNER, D_MODEL)), init(ks[11], (1, D_MODEL)),           # W2, b2
        jnp.ones((1, D_MODEL), jnp.float32), jnp.zeros((1, D_MODEL), jnp.float32),  # LN2
    )
    packed_w = pack_params(params)

    enc_input = jax.random.normal(jax.random.PRNGKey(42), (B, L, D_MODEL), jnp.float32)

    # sequence lengths [8, 6] -> padding masks
    lens = np.array([L, 6])
    pos = np.arange(L)
    non_pad = (pos[None, :] < lens[:, None]).astype(np.float32)           # (B, L)
    non_pad_mask = jnp.asarray(non_pad[:, :, None])                       # (B, L, 1)
    slf_attn_mask = jnp.asarray(
        np.broadcast_to((pos[None, None, :] >= lens[:, None, None]), (B, L, L)).astype(np.int32))

    enc_out, enc_slf_attn = encoder_layer(enc_input, non_pad_mask, slf_attn_mask, packed_w)
    jax.block_until_ready((enc_out, enc_slf_attn))

    # bf16 weight slab / bf16 MXU operands vs pure-f32 reference -> loosened tolerances.
    ref_out, ref_attn = encoder_layer_ref(enc_input, non_pad_mask, slf_attn_mask, params)
    np.testing.assert_allclose(np.asarray(enc_out), np.asarray(ref_out), rtol=3e-2, atol=3e-2)
    np.testing.assert_allclose(np.asarray(enc_slf_attn), np.asarray(ref_attn), rtol=2e-2, atol=5e-3)

    print("KERNEL_OK")
</pallas_src>

<mosaic_0001>
module attributes {stable_mosaic.version = 11 : i64} {
  func.func @encoder_layer_kernel(%arg0: i32, %arg1: memref<16x32xf32, #tpu.memory_space<vmem>>, %arg2: memref<16x1xf32, #tpu.memory_space<vmem>>, %arg3: memref<2x8x8xi32, #tpu.memory_space<vmem>>, %arg4: memref<136x128xbf16, #tpu.memory_space<vmem>>, %arg5: memref<16x32xf32, #tpu.memory_space<vmem>>, %arg6: memref<8x8x8xf32, #tpu.memory_space<vmem>>) attributes {dimension_semantics = [#tpu.dimension_semantics<parallel>], iteration_bounds = array<i64: 1>, scalar_prefetch = 0 : i64, scratch_operands = 0 : i64, tpu.core_type = #tpu.core_type<tc>, window_params = [{transform_indices = @transform_0, window_bounds = array<i64: 16, 32>}, {transform_indices = @transform_1, window_bounds = array<i64: 16, 1>}, {transform_indices = @transform_2, window_bounds = array<i64: 2, 8, 8>}, {pipeline_mode = #tpu.pipeline_mode<synchronous>, transform_indices = @transform_3, window_bounds = array<i64: 136, 128>}, {transform_indices = @transform_4, window_bounds = array<i64: 16, 32>}, {transform_indices = @transform_5, window_bounds = array<i64: 8, 8, 8>}]} {
    %c0 = arith.constant 0 : index
    %c0_0 = arith.constant 0 : index
    %0 = vector.load %arg1[%c0, %c0_0] : memref<16x32xf32, #tpu.memory_space<vmem>>, vector<16x32xf32>
    %c0_1 = arith.constant 0 : index
    %c0_2 = arith.constant 0 : index
    %1 = vector.load %arg2[%c0_1, %c0_2] : memref<16x1xf32, #tpu.memory_space<vmem>>, vector<16x1xf32>
    %2 = arith.truncf %0 : vector<16x32xf32> to vector<16x32xbf16>
    %c0_3 = arith.constant 0 : index
    %c0_4 = arith.constant 0 : index
    %3 = vector.load %arg4[%c0_3, %c0_4] : memref<136x128xbf16, #tpu.memory_space<vmem>>, vector<32x64xbf16>
    %c128 = arith.constant 128 : index
    %c0_5 = arith.constant 0 : index
    %4 = vector.load %arg4[%c128, %c0_5] : memref<136x128xbf16, #tpu.memory_space<vmem>>, vector<1x64xbf16>
    %5 = arith.extf %4 : vector<1x64xbf16> to vector<1x64xf32>
    %cst = arith.constant dense<0.000000e+00> : vector<16x64xf32>
    %6 = tpu.matmul %2, %3, %cst {dimension_numbers = #tpu.dot_dimension_numbers<[1], [0], [0], [1], [0, 0, 1, 1], [], []>} : vector<16x32xbf16>, vector<32x64xbf16>, vector<16x64xf32> -> vector<16x64xf32>
    %7 = vector.broadcast %5 : vector<1x64xf32> to vector<16x64xf32>
    %8 = arith.addf %6, %7 : vector<16x64xf32>
    %c32 = arith.constant 32 : index
    %c0_6 = arith.constant 0 : index
    %9 = vector.load %arg4[%c32, %c0_6] : memref<136x128xbf16, #tpu.memory_space<vmem>>, vector<32x128xbf16>
    %cst_7 = arith.constant dense<0.000000e+00> : vector<16x128xf32>
    %10 = tpu.matmul %2, %9, %cst_7 {dimension_numbers = #tpu.dot_dimension_numbers<[1], [0], [0], [1], [0, 0, 1, 1], [], []>} : vector<16x32xbf16>, vector<32x128xbf16>, vector<16x128xf32> -> vector<16x128xf32>
    %11 = vector.extract_strided_slice %8 {offsets = [0, 0], sizes = [8, 8], strides = [1, 1]} : vector<16x64xf32> to vector<8x8xf32>
    %12 = vector.shape_cast %11 : vector<8x8xf32> to vector<1x8x8xf32>
    %13 = vector.extract_strided_slice %8 {offsets = [8, 0], sizes = [8, 8], strides = [1, 1]} : vector<16x64xf32> to vector<8x8xf32>
    %14 = vector.shape_cast %13 : vector<8x8xf32> to vector<1x8x8xf32>
    %15 = vector.extract_strided_slice %8 {offsets = [0, 8], sizes = [8, 8], strides = [1, 1]} : vector<16x64xf32> to vector<8x8xf32>
    %16 = vector.shape_cast %15 : vector<8x8xf32> to vector<1x8x8xf32>
    %17 = vector.extract_strided_slice %8 {offsets = [8, 8], sizes = [8, 8], strides = [1, 1]} : vector<16x64xf32> to vector<8x8xf32>
    %18 = vector.shape_cast %17 : vector<8x8xf32> to vector<1x8x8xf32>
    %19 = vector.extract_strided_slice %8 {offsets = [0, 16], sizes = [8, 8], strides = [1, 1]} : vector<16x64xf32> to vector<8x8xf32>
    %20 = vector.shape_cast %19 : vector<8x8xf32> to vector<1x8x8xf32>
    %21 = vector.extract_strided_slice %8 {offsets = [8, 16], sizes = [8, 8], strides = [1, 1]} : vector<16x64xf32> to vector<8x8xf32>
    %22 = vector.shape_cast %21 : vector<8x8xf32> to vector<1x8x8xf32>
    %23 = vector.extract_strided_slice %8 {offsets = [0, 24], sizes = [8, 8], strides = [1, 1]} : vector<16x64xf32> to vector<8x8xf32>
    %24 = vector.shape_cast %23 : vector<8x8xf32> to vector<1x8x8xf32>
    %25 = vector.extract_strided_slice %8 {offsets = [8, 24], sizes = [8, 8], strides = [1, 1]} : vector<16x64xf32> to vector<8x8xf32>
    %26 = vector.shape_cast %25 : vector<8x8xf32> to vector<1x8x8xf32>
    %27 = tpu.concatenate %12, %14, %16, %18, %20, %22, %24, %26 in 0 : vector<1x8x8xf32>, vector<1x8x8xf32>, vector<1x8x8xf32>, vector<1x8x8xf32>, vector<1x8x8xf32>, vector<1x8x8xf32>, vector<1x8x8xf32>, vector<1x8x8xf32> -> vector<8x8x8xf32>
    %28 = vector.extract_strided_slice %8 {offsets = [0, 32], sizes = [8, 8], strides = [1, 1]} : vector<16x64xf32> to vector<8x8xf32>
    %29 = vector.shape_cast %28 : vector<8x8xf32> to vector<1x8x8xf32>
    %30 = vector.extract_strided_slice %8 {offsets = [8, 32], sizes = [8, 8], strides = [1, 1]} : vector<16x64xf32> to vector<8x8xf32>
    %31 = vector.shape_cast %30 : vector<8x8xf32> to vector<1x8x8xf32>
    %32 = vector.extract_strided_slice %8 {offsets = [0, 40], sizes = [8, 8], strides = [1, 1]} : vector<16x64xf32> to vector<8x8xf32>
    %33 = vector.shape_cast %32 : vector<8x8xf32> to vector<1x8x8xf32>
    %34 = vector.extract_strided_slice %8 {offsets = [8, 40], sizes = [8, 8], strides = [1, 1]} : vector<16x64xf32> to vector<8x8xf32>
    %35 = vector.shape_cast %34 : vector<8x8xf32> to vector<1x8x8xf32>
    %36 = vector.extract_strided_slice %8 {offsets = [0, 48], sizes = [8, 8], strides = [1, 1]} : vector<16x64xf32> to vector<8x8xf32>
    %37 = vector.shape_cast %36 : vector<8x8xf32> to vector<1x8x8xf32>
    %38 = vector.extract_strided_slice %8 {offsets = [8, 48], sizes = [8, 8], strides = [1, 1]} : vector<16x64xf32> to vector<8x8xf32>
    %39 = vector.shape_cast %38 : vector<8x8xf32> to vector<1x8x8xf32>
    %40 = vector.extract_strided_slice %8 {offsets = [0, 56], sizes = [8, 8], strides = [1, 1]} : vector<16x64xf32> to vector<8x8xf32>
    %41 = vector.shape_cast %40 : vector<8x8xf32> to vector<1x8x8xf32>
    %42 = vector.extract_strided_slice %8 {offsets = [8, 56], sizes = [8, 8], strides = [1, 1]} : vector<16x64xf32> to vector<8x8xf32>
    %43 = vector.shape_cast %42 : vector<8x8xf32> to vector<1x8x8xf32>
    %44 = tpu.concatenate %29, %31, %33, %35, %37, %39, %41, %43 in 0 : vector<1x8x8xf32>, vector<1x8x8xf32>, vector<1x8x8xf32>, vector<1x8x8xf32>, vector<1x8x8xf32>, vector<1x8x8xf32>, vector<1x8x8xf32>, vector<1x8x8xf32> -> vector<8x8x8xf32>
    %45 = vector.extract_strided_slice %10 {offsets = [0, 0], sizes = [8, 32], strides = [1, 1]} : vector<16x128xf32> to vector<8x32xf32>
    %46 = vector.shape_cast %45 : vector<8x32xf32> to vector<1x8x32xf32>
    %47 = vector.extract_strided_slice %10 {offsets = [8, 0], sizes = [8, 32], strides = [1, 1]} : vector<16x128xf32> to vector<8x32xf32>
    %48 = vector.shape_cast %47 : vector<8x32xf32> to vector<1x8x32xf32>
    %49 = vector.extract_strided_slice %10 {offsets = [0, 32], sizes = [8, 32], strides = [1, 1]} : vector<16x128xf32> to vector<8x32xf32>
    %50 = vector.shape_cast %49 : vector<8x32xf32> to vector<1x8x32xf32>
    %51 = vector.extract_strided_slice %10 {offsets = [8, 32], sizes = [8, 32], strides = [1, 1]} : vector<16x128xf32> to vector<8x32xf32>
    %52 = vector.shape_cast %51 : vector<8x32xf32> to vector<1x8x32xf32>
    %53 = vector.extract_strided_slice %10 {offsets = [0, 64], sizes = [8, 32], strides = [1, 1]} : vector<16x128xf32> to vector<8x32xf32>
    %54 = vector.shape_cast %53 : vector<8x32xf32> to vector<1x8x32xf32>
    %55 = vector.extract_strided_slice %10 {offsets = [8, 64], sizes = [8, 32], strides = [1, 1]} : vector<16x128xf32> to vector<8x32xf32>
    %56 = vector.shape_cast %55 : vector<8x32xf32> to vector<1x8x32xf32>
    %57 = vector.extract_strided_slice %10 {offsets = [0, 96], sizes = [8, 32], strides = [1, 1]} : vector<16x128xf32> to vector<8x32xf32>
    %58 = vector.shape_cast %57 : vector<8x32xf32> to vector<1x8x32xf32>
    %59 = vector.extract_strided_slice %10 {offsets = [8, 96], sizes = [8, 32], strides = [1, 1]} : vector<16x128xf32> to vector<8x32xf32>
    %60 = vector.shape_cast %59 : vector<8x32xf32> to vector<1x8x32xf32>
    %61 = tpu.concatenate %46, %48, %50, %52, %54, %56, %58, %60 in 0 : vector<1x8x32xf32>, vector<1x8x32xf32>, vector<1x8x32xf32>, vector<1x8x32xf32>, vector<1x8x32xf32>, vector<1x8x32xf32>, vector<1x8x32xf32>, vector<1x8x32xf32> -> vector<8x8x32xf32>
    "tpu.trace_start"() <{level = 10 : i32, message = "bqd,bkd->bqk"}> : () -> ()
    %cst_8 = arith.constant dense<0.000000e+00> : vector<8x8x8xf32>
    %62 = tpu.matmul %27, %44, %cst_8 {dimension_numbers = #tpu.dot_dimension_numbers<[2], [2], [1], [1], [0, 0, 0, 1, 1, 1], [0], [0]>} : vector<8x8x8xf32>, vector<8x8x8xf32>, vector<8x8x8xf32> -> vector<8x8x8xf32>
    "tpu.trace_stop"() : () -> ()
    %c0_9 = arith.constant 0 : index
    %c0_10 = arith.constant 0 : index
    %c0_11 = arith.constant 0 : index
    %63 = vector.load %arg3[%c0_9, %c0_10, %c0_11] : memref<2x8x8xi32, #tpu.memory_space<vmem>>, vector<2x8x8xi32>
    %c0_i32 = arith.constant 0 : i32
    %64 = vector.broadcast %c0_i32 : i32 to vector<2x8x8xi32>
    %65 = arith.cmpi ne, %63, %64 : vector<2x8x8xi32>
    %cst_12 = arith.constant -1.000000e+30 : f32
    %cst_13 = arith.constant 0.000000e+00 : f32
    %66 = vector.broadcast %cst_12 : f32 to vector<2x8x8xf32>
    %67 = vector.broadcast %cst_13 : f32 to vector<2x8x8xf32>
    %68 = arith.select %65, %66, %67 : vector<2x8x8xi1>, vector<2x8x8xf32>
    %69 = vector.shape_cast %62 : vector<8x8x8xf32> to vector<4x2x8x8xf32>
    %70 = vector.shape_cast %68 : vector<2x8x8xf32> to vector<1x2x8x8xf32>
    %71 = vector.broadcast %70 : vector<1x2x8x8xf32> to vector<4x2x8x8xf32>
    %72 = arith.addf %69, %71 : vector<4x2x8x8xf32>
    %cst_14 = arith.constant dense<0xFF800000> : vector<4x2x8xf32>
    %73 = vector.multi_reduction <maximumf>, %72, %cst_14 [3] : vector<4x2x8x8xf32> to vector<4x2x8xf32>
    %74 = vector.shape_cast %73 : vector<4x2x8xf32> to vector<4x2x8x1xf32>
    %75 = vector.broadcast %74 : vector<4x2x8x1xf32> to vector<4x2x8x8xf32>
    %76 = arith.subf %72, %75 : vector<4x2x8x8xf32>
    %77 = math.exp %76 : vector<4x2x8x8xf32>
    %cst_15 = arith.constant dense<0.000000e+00> : vector<4x2x8xf32>
    %78 = vector.multi_reduction <add>, %77, %cst_15 [3] : vector<4x2x8x8xf32> to vector<4x2x8xf32>
    %79 = vector.shape_cast %78 : vector<4x2x8xf32> to vector<4x2x8x1xf32>
    %80 = tpu.reciprocal %79 {approx = true} : vector<4x2x8x1xf32> -> vector<4x2x8x1xf32>
    %81 = vector.broadcast %80 : vector<4x2x8x1xf32> to vector<4x2x8x8xf32>
    %82 = arith.mulf %77, %81 : vector<4x2x8x8xf32>
    %83 = vector.shape_cast %82 : vector<4x2x8x8xf32> to vector<8x8x8xf32>
    %c0_16 = arith.constant 0 : index
    %c0_17 = arith.constant 0 : index
    %c0_18 = arith.constant 0 : index
    %84 = vector.load %arg6[%c0_16, %c0_17, %c0_18] : memref<8x8x8xf32, #tpu.memory_space<vmem>>, vector<8x8x8xf32>
    tpu.vector_store %arg6[%c0_16, %c0_17, %c0_18], %83 {strides = array<i32>} : memref<8x8x8xf32, #tpu.memory_space<vmem>>, vector<8x8x8xf32>,
    "tpu.trace_start"() <{level = 10 : i32, message = "bqk,bkd->bqd"}> : () -> ()
    %cst_19 = arith.constant dense<0.000000e+00> : vector<8x8x32xf32>
    %85 = tpu.matmul %83, %61, %cst_19 {dimension_numbers = #tpu.dot_dimension_numbers<[2], [1], [1], [2], [0, 0, 0, 1, 1, 2], [0], [0]>} : vector<8x8x8xf32>, vector<8x8x32xf32>, vector<8x8x32xf32> -> vector<8x8x32xf32>
    "tpu.trace_stop"() : () -> ()
    %86 = vector.extract_strided_slice %85 {offsets = [0, 0, 0], sizes = [1, 8, 32], strides = [1, 1, 1]} : vector<8x8x32xf32> to vector<1x8x32xf32>
    %87 = vector.shape_cast %86 : vector<1x8x32xf32> to vector<8x32xf32>
    %cst_20 = arith.constant 0.000000e+00 : f32
    %88 = vector.broadcast %cst_20 : f32 to vector<8x32xf32>
    %89 = arith.addf %88, %87 : vector<8x32xf32>
    %90 = vector.extract_strided_slice %85 {offsets = [2, 0, 0], sizes = [1, 8, 32], strides = [1, 1, 1]} : vector<8x8x32xf32> to vector<1x8x32xf32>
    %91 = vector.shape_cast %90 : vector<1x8x32xf32> to vector<8x32xf32>
    %92 = arith.addf %89, %91 : vector<8x32xf32>
    %93 = vector.extract_strided_slice %85 {offsets = [4, 0, 0], sizes = [1, 8, 32], strides = [1, 1, 1]} : vector<8x8x32xf32> to vector<1x8x32xf32>
    %94 = vector.shape_cast %93 : vector<1x8x32xf32> to vector<8x32xf32>
    %95 = arith.addf %92, %94 : vector<8x32xf32>
    %96 = vector.extract_strided_slice %85 {offsets = [6, 0, 0], sizes = [1, 8, 32], strides = [1, 1, 1]} : vector<8x8x32xf32> to vector<1x8x32xf32>
    %97 = vector.shape_cast %96 : vector<1x8x32xf32> to vector<8x32xf32>
    %98 = arith.addf %95, %97 : vector<8x32xf32>
    %99 = vector.extract_strided_slice %85 {offsets = [1, 0, 0], sizes = [1, 8, 32], strides = [1, 1, 1]} : vector<8x8x32xf32> to vector<1x8x32xf32>
    %100 = vector.shape_cast %99 : vector<1x8x32xf32> to vector<8x32xf32>
    %cst_21 = arith.constant 0.000000e+00 : f32
    %101 = vector.broadcast %cst_21 : f32 to vector<8x32xf32>
    %102 = arith.addf %101, %100 : vector<8x32xf32>
    %103 = vector.extract_strided_slice %85 {offsets = [3, 0, 0], sizes = [1, 8, 32], strides = [1, 1, 1]} : vector<8x8x32xf32> to vector<1x8x32xf32>
    %104 = vector.shape_cast %103 : vector<1x8x32xf32> to vector<8x32xf32>
    %105 = arith.addf %102, %104 : vector<8x32xf32>
    %106 = vector.extract_strided_slice %85 {offsets = [5, 0, 0], sizes = [1, 8, 32], strides = [1, 1, 1]} : vector<8x8x32xf32> to vector<1x8x32xf32>
    %107 = vector.shape_cast %106 : vector<1x8x32xf32> to vector<8x32xf32>
    %108 = arith.addf %105, %107 : vector<8x32xf32>
    %109 = vector.extract_strided_slice %85 {offsets = [7, 0, 0], sizes = [1, 8, 32], strides = [1, 1, 1]} : vector<8x8x32xf32> to vector<1x8x32xf32>
    %110 = vector.shape_cast %109 : vector<1x8x32xf32> to vector<8x32xf32>
    %111 = arith.addf %108, %110 : vector<8x32xf32>
    %112 = tpu.concatenate %98, %111 in 0 : vector<8x32xf32>, vector<8x32xf32> -> vector<16x32xf32>
    %c129 = arith.constant 129 : index
    %c0_22 = arith.constant 0 : index
    %113 = vector.load %arg4[%c129, %c0_22] : memref<136x128xbf16, #tpu.memory_space<vmem>>, vector<1x32xbf16>
    %114 = arith.extf %113 : vector<1x32xbf16> to vector<1x32xf32>
    %115 = vector.broadcast %114 : vector<1x32xf32> to vector<16x32xf32>
    %116 = arith.addf %112, %115 : vector<16x32xf32>
    %117 = arith.addf %116, %0 : vector<16x32xf32>
    %c130 = arith.constant 130 : index
    %c0_23 = arith.constant 0 : index
    %118 = vector.load %arg4[%c130, %c0_23] : memref<136x128xbf16, #tpu.memory_space<vmem>>, vector<1x32xbf16>
    %119 = arith.extf %118 : vector<1x32xbf16> to vector<1x32xf32>
    %c131 = arith.constant 131 : index
    %c0_24 = arith.constant 0 : index
    %120 = vector.load %arg4[%c131, %c0_24] : memref<136x128xbf16, #tpu.memory_space<vmem>>, vector<1x32xbf16>
    %121 = arith.extf %120 : vector<1x32xbf16> to vector<1x32xf32>
    %cst_25 = arith.constant dense<0.000000e+00> : vector<16xf32>
    %122 = vector.multi_reduction <add>, %117, %cst_25 [1] : vector<16x32xf32> to vector<16xf32>
    %123 = vector.shape_cast %122 : vector<16xf32> to vector<16x1xf32>
    %cst_26 = arith.constant 3.200000e+01 : f32
    %124 = vector.broadcast %cst_26 : f32 to vector<16x1xf32>
    %125 = arith.divf %123, %124 : vector<16x1xf32>
    %126 = vector.broadcast %125 : vector<16x1xf32> to vector<16x32xf32>
    %127 = arith.subf %117, %126 : vector<16x32xf32>
    %128 = arith.mulf %127, %127 : vector<16x32xf32>
    %cst_27 = arith.constant dense<0.000000e+00> : vector<16xf32>
    %129 = vector.multi_reduction <add>, %128, %cst_27 [1] : vector<16x32xf32> to vector<16xf32>
    %130 = vector.shape_cast %129 : vector<16xf32> to vector<16x1xf32>
    %cst_28 = arith.constant 3.200000e+01 : f32
    %131 = vector.broadcast %cst_28 : f32 to vector<16x1xf32>
    %132 = arith.divf %130, %131 : vector<16x1xf32>
    %cst_29 = arith.constant 9.99999974E-6 : f32
    %133 = vector.broadcast %cst_29 : f32 to vector<16x1xf32>
    %134 = arith.addf %132, %133 : vector<16x1xf32>
    %135 = math.rsqrt %134 : vector<16x1xf32>
    %136 = vector.broadcast %125 : vector<16x1xf32> to vector<16x32xf32>
    %137 = arith.subf %117, %136 : vector<16x32xf32>
    %138 = vector.broadcast %135 : vector<16x1xf32> to vector<16x32xf32>
    %139 = arith.mulf %137, %138 : vector<16x32xf32>
    %140 = vector.broadcast %119 : vector<1x32xf32> to vector<16x32xf32>
    %141 = arith.mulf %139, %140 : vector<16x32xf32>
    %142 = vector.broadcast %121 : vector<1x32xf32> to vector<16x32xf32>
    %143 = arith.addf %141, %142 : vector<16x32xf32>
    %144 = vector.broadcast %1 : vector<16x1xf32> to vector<16x32xf32>
    %145 = arith.mulf %143, %144 : vector<16x32xf32>
    %146 = arith.truncf %145 : vector<16x32xf32> to vector<16x32xbf16>
    %c64 = arith.constant 64 : index
    %c0_30 = arith.constant 0 : index
    %147 = vector.load %arg4[%c64, %c0_30] : memref<136x128xbf16, #tpu.memory_space<vmem>>, vector<32x64xbf16>
    %c132 = arith.constant 132 : index
    %c0_31 = arith.constant 0 : index
    %148 = vector.load %arg4[%c132, %c0_31] : memref<136x128xbf16, #tpu.memory_space<vmem>>, vector<1x64xbf16>
    %149 = arith.extf %148 : vector<1x64xbf16> to vector<1x64xf32>
    %cst_32 = arith.constant dense<0.000000e+00> : vector<16x64xf32>
    %150 = tpu.matmul %146, %147, %cst_32 {dimension_numbers = #tpu.dot_dimension_numbers<[1], [0], [0], [1], [0, 0, 1, 1], [], []>} : vector<16x32xbf16>, vector<32x64xbf16>, vector<16x64xf32> -> vector<16x64xf32>
    %151 = vector.broadcast %149 : vector<1x64xf32> to vector<16x64xf32>
    %152 = arith.addf %150, %151 : vector<16x64xf32>
    %cst_33 = arith.constant 0.000000e+00 : f32
    %153 = vector.broadcast %cst_33 : f32 to vector<16x64xf32>
    %154 = arith.maximumf %152, %153 : vector<16x64xf32>
    %155 = arith.truncf %154 : vector<16x64xf32> to vector<16x64xbf16>
    %c96 = arith.constant 96 : index
    %c0_34 = arith.constant 0 : index
    %156 = vector.load %arg4[%c96, %c0_34] : memref<136x128xbf16, #tpu.memory_space<vmem>>, vector<32x32xbf16>
    %c96_35 = arith.constant 96 : index
    %c32_36 = arith.constant 32 : index
    %157 = vector.load %arg4[%c96_35, %c32_36] : memref<136x128xbf16, #tpu.memory_space<vmem>>, vector<32x32xbf16>
    %c133 = arith.constant 133 : index
    %c0_37 = arith.constant 0 : index
    %158 = vector.load %arg4[%c133, %c0_37] : memref<136x128xbf16, #tpu.memory_space<vmem>>, vector<1x32xbf16>
    %159 = arith.extf %158 : vector<1x32xbf16> to vector<1x32xf32>
    %160 = vector.extract_strided_slice %155 {offsets = [0, 0], sizes = [16, 32], strides = [1, 1]} : vector<16x64xbf16> to vector<16x32xbf16>
    %cst_38 = arith.constant dense<0.000000e+00> : vector<16x32xf32>
    %161 = tpu.matmul %160, %156, %cst_38 {dimension_numbers = #tpu.dot_dimension_numbers<[1], [0], [0], [1], [0, 0, 1, 1], [], []>} : vector<16x32xbf16>, vector<32x32xbf16>, vector<16x32xf32> -> vector<16x32xf32>
    %162 = vector.extract_strided_slice %155 {offsets = [0, 32], sizes = [16, 32], strides = [1, 1]} : vector<16x64xbf16> to vector<16x32xbf16>
    %cst_39 = arith.constant dense<0.000000e+00> : vector<16x32xf32>
    %163 = tpu.matmul %162, %157, %cst_39 {dimension_numbers = #tpu.dot_dimension_numbers<[1], [0], [0], [1], [0, 0, 1, 1], [], []>} : vector<16x32xbf16>, vector<32x32xbf16>, vector<16x32xf32> -> vector<16x32xf32>
    %164 = arith.addf %161, %163 : vector<16x32xf32>
    %165 = vector.broadcast %159 : vector<1x32xf32> to vector<16x32xf32>
    %166 = arith.addf %164, %165 : vector<16x32xf32>
    %167 = arith.addf %166, %145 : vector<16x32xf32>
    %c134 = arith.constant 134 : index
    %c0_40 = arith.constant 0 : index
    %168 = vector.load %arg4[%c134, %c0_40] : memref<136x128xbf16, #tpu.memory_space<vmem>>, vector<1x32xbf16>
    %169 = arith.extf %168 : vector<1x32xbf16> to vector<1x32xf32>
    %c135 = arith.constant 135 : index
    %c0_41 = arith.constant 0 : index
    %170 = vector.load %arg4[%c135, %c0_41] : memref<136x128xbf16, #tpu.memory_space<vmem>>, vector<1x32xbf16>
    %171 = arith.extf %170 : vector<1x32xbf16> to vector<1x32xf32>
    %cst_42 = arith.constant dense<0.000000e+00> : vector<16xf32>
    %172 = vector.multi_reduction <add>, %167, %cst_42 [1] : vector<16x32xf32> to vector<16xf32>
    %173 = vector.shape_cast %172 : vector<16xf32> to vector<16x1xf32>
    %cst_43 = arith.constant 3.200000e+01 : f32
    %174 = vector.broadcast %cst_43 : f32 to vector<16x1xf32>
    %175 = arith.divf %173, %174 : vector<16x1xf32>
    %176 = vector.broadcast %175 : vector<16x1xf32> to vector<16x32xf32>
    %177 = arith.subf %167, %176 : vector<16x32xf32>
    %178 = arith.mulf %177, %177 : vector<16x32xf32>
    %cst_44 = arith.constant dense<0.000000e+00> : vector<16xf32>
    %179 = vector.multi_reduction <add>, %178, %cst_44 [1] : vector<16x32xf32> to vector<16xf32>
    %180 = vector.shape_cast %179 : vector<16xf32> to vector<16x1xf32>
    %cst_45 = arith.constant 3.200000e+01 : f32
    %181 = vector.broadcast %cst_45 : f32 to vector<16x1xf32>
    %182 = arith.divf %180, %181 : vector<16x1xf32>
    %cst_46 = arith.constant 9.99999974E-6 : f32
    %183 = vector.broadcast %cst_46 : f32 to vector<16x1xf32>
    %184 = arith.addf %182, %183 : vector<16x1xf32>
    %185 = math.rsqrt %184 : vector<16x1xf32>
    %186 = vector.broadcast %175 : vector<16x1xf32> to vector<16x32xf32>
    %187 = arith.subf %167, %186 : vector<16x32xf32>
    %188 = vector.broadcast %185 : vector<16x1xf32> to vector<16x32xf32>
    %189 = arith.mulf %187, %188 : vector<16x32xf32>
    %190 = vector.broadcast %169 : vector<1x32xf32> to vector<16x32xf32>
    %191 = arith.mulf %189, %190 : vector<16x32xf32>
    %192 = vector.broadcast %171 : vector<1x32xf32> to vector<16x32xf32>
    %193 = arith.addf %191, %192 : vector<16x32xf32>
    %194 = vector.broadcast %1 : vector<16x1xf32> to vector<16x32xf32>
    %195 = arith.mulf %193, %194 : vector<16x32xf32>
    %c0_47 = arith.constant 0 : index
    %c0_48 = arith.constant 0 : index
    %196 = vector.load %arg5[%c0_47, %c0_48] : memref<16x32xf32, #tpu.memory_space<vmem>>, vector<16x32xf32>
    tpu.vector_store %arg5[%c0_47, %c0_48], %195 {strides = array<i32>} : memref<16x32xf32, #tpu.memory_space<vmem>>, vector<16x32xf32>,
    return
  }
  func.func @transform_0(%arg0: i32) -> (i32, i32) {
    %c0_i32 = arith.constant 0 : i32
    %c0_i32_0 = arith.constant 0 : i32
    return %arg0, %c0_i32 : i32, i32
  }
  func.func @transform_1(%arg0: i32) -> (i32, i32) {
    %c0_i32 = arith.constant 0 : i32
    %c0_i32_0 = arith.constant 0 : i32
    return %arg0, %c0_i32 : i32, i32
  }
  func.func @transform_2(%arg0: i32) -> (i32, i32, i32) {
    %c0_i32 = arith.constant 0 : i32
    %c0_i32_0 = arith.constant 0 : i32
    %c0_i32_1 = arith.constant 0 : i32
    return %arg0, %c0_i32, %c0_i32_0 : i32, i32, i32
  }
  func.func @transform_3(%arg0: i32) -> (i32, i32) {
    %c0_i32 = arith.constant 0 : i32
    %c0_i32_0 = arith.constant 0 : i32
    %c0_i32_1 = arith.constant 0 : i32
    return %c0_i32, %c0_i32_0 : i32, i32
  }
  func.func @transform_4(%arg0: i32) -> (i32, i32) {
    %c0_i32 = arith.constant 0 : i32
    %c0_i32_0 = arith.constant 0 : i32
    return %arg0, %c0_i32 : i32, i32
  }
  func.func @transform_5(%arg0: i32) -> (i32, i32, i32) {
    %c0_i32 = arith.constant 0 : i32
    %c0_i32_0 = arith.constant 0 : i32
    %c0_i32_1 = arith.constant 0 : i32
    return %arg0, %c0_i32, %c0_i32_0 : i32, i32, i32
  }
}

</mosaic_0001>

<bundles_post_ra>
// kernel: tpu_custom_call.1
= control target key start
LH: loop header
LB: loop body
LE: loop exit
PB: predicated region body
PF: predicated region fallthrough
CT: control target
= control target key end

     0   :  { %11 = vsyncpa [#allocation3], 0  ;;  %s2541_s0 = inlined_call_operand.vmem [shape: f32[16,32], index: 0, kind: input, shape index: {}]   ;;  %s2542_s1 = inlined_call_operand.vmem [shape: f32[16,1], index: 1, kind: input, shape index: {}]   ;;  %s2543_s2 = inlined_call_operand.hbm [shape: s32[2,8,8], index: 2, kind: input, shape index: {}]   ;;  %s2544_s3 = inlined_call_operand.hbm [shape: bf16[136,128], index: 3, kind: input, shape index: {}]   ;;  %s2545_s4 = inlined_call_operand.hbm [shape: f32[16,32], index: 4, kind: output, shape index: {0}]   ;;  %s2546_s5 = inlined_call_operand.hbm [shape: f32[8,8,8], index: 5, kind: output, shape index: {1}]  }
   0x1   :  { %12 = vsyncpa [#allocation6], 0 }
   0x2   :  { %13 = vsyncpa [#allocation4], 0 }
   0x3   :  { %14 = vsyncpa [#allocation9], 0  ;;  %s2222_s18 = smov [#allocation2]   ;;  %s2126_s22 = scalar_lea.hbm %s2543_s2, 256 }
   0x4   :  { %s24_s19 = sshll.u32 %s2222_s18, 4  ;;  %p2127_p0 = scmp.ne.s32.totalorder %s2543_s2, %s2126_s22  ;;  %s25_s19 = int_to_ptr.vmem [resolvable:$true] %s24_s19 }
   0x5   :  { %p2130_p1 = scmp.lt.u32.totalorder %s2126_s22, %s2543_s2 }
   0x7   :  { %p2132_p2 = pnand %p2130_p1, %p2127_p0 }
   0x9   :  { %2135 = shalt.err (!%p2132_p2)
}
   0xa   :  { %s2136_s27 = scalar_lea.vmem %s25_s19, 256  ;;  %p2141_p4 = scmp.lt.s32.totalorder %s25_s19, %s25_s19 }
   0xb   :  { %p2137_p3 = scmp.ne.s32.totalorder %s25_s19, %s2136_s27  ;;  %p2142_p5 = scmp.lt.s32.totalorder %s2136_s27, %s2136_s27 }
   0xd   :  { %p2143_p6 = por %p2142_p5, %p2141_p4 }
   0xf   :  { %p2144_p7 = pnand %p2143_p6, %p2137_p3 }
  0x11   :  { %2147 = shalt.err (!%p2144_p7)
}
  0x12   :  { %s2223_s28 = smov 128   ;;  %s2224_s29 = smov 8  }
  0x13   :  { %30 = dma.hbm_to_vmem [thread:$0]  %s2543_s2, 256, %s25_s19, [#allocation3], %s2223_s28, %s2223_s28, %s2224_s29  }
  0x14   :  { %s2225_s7 = smov [#allocation5]   ;;  %s2148_s11 = scalar_lea.hbm %s2544_s3, 1088 }
  0x15   :  { %s36_s8 = sshll.u32 %s2225_s7, 4  ;;  %p2149_p8 = scmp.ne.s32.totalorder %s2544_s3, %s2148_s11  ;;  %s37_s8 = int_to_ptr.vmem [resolvable:$true] %s36_s8 }
  0x16   :  { %p2152_p9 = scmp.lt.u32.totalorder %s2148_s11, %s2544_s3 }
  0x18   :  { %p2154_p10 = pnand %p2152_p9, %p2149_p8 }
  0x1a   :  { %2157 = shalt.err (!%p2154_p10)
}
  0x1b   :  { %s2158_s16 = scalar_lea.vmem %s37_s8, 1088  ;;  %p2163_p12 = scmp.lt.s32.totalorder %s37_s8, %s37_s8 }
  0x1c   :  { %p2159_p11 = scmp.ne.s32.totalorder %s37_s8, %s2158_s16  ;;  %p2164_p13 = scmp.lt.s32.totalorder %s2158_s16, %s2158_s16 }
  0x1e   :  { %p2165_p0 = por %p2164_p13, %p2163_p12 }
  0x20   :  { %p2166_p1 = pnand %p2165_p0, %p2159_p11 }
  0x22   :  { %2169 = shalt.err (!%p2166_p1)
}
  0x23   :  { %s2226_s2 = smov 64   ;;  %s2227_s17 = smov 4  }
  0x24   :  { %42 = dma.hbm_to_vmem [thread:$0]  %s2544_s3, 1088, %s37_s8, [#allocation6], %s2226_s2, %s2226_s2, %s2227_s17  }
  0x25   :  { %2214 = dma.done.wait [#allocation3], 256  }
  0x26   :  { %2215 = vsyncadd [#allocation3], 4294967040 }
  0x27   :  { %2216 = dma.done.wait [#allocation6], 1088  }
  0x28   :  { %2217 = vsyncadd [#allocation6], 4294966208  ;;  %v2228_v0 = vmov 0.0   ;;  %vm2229_vm0 = vmmov 0   ;;  %v2078_v1 = vld [vmem:[#allocation5] sm:$0xff]   ;;  %v2079_v2 = vld [vmem:[#allocation5 + $0x8] sm:$0xff]   ;;  %v61_v7 = vlaneseq }
  0x29   :  { %1940 = vmatprep.subr.bf16.mxu0 %v2228_v0  ;;  %1944 = vmatprep.mubr.msk.bf16.mxu0 %vm2229_vm0, %v2228_v0  ;;  %v2306_v3 = vld [vmem:[%s2541_s0] sm:$0xff]  ;;  %v2311_v4 = vld [vmem:[%s2541_s0 + $0x8] sm:$0xff]  ;;  %vm77_vm1 = vcmask 261120   ;;  %v59_v9 = vld [vmem:[#allocation5 + $0x40] sm:$0x1]  ;;  %s2230_s0 = smov 112  }
  0x2a   :  { %1948 = vmatprep.subr.bf16.mxu1 %v2228_v0  ;;  %1952 = vmatprep.mubr.msk.bf16.mxu1 %vm2229_vm0, %v2228_v0  ;;  %v54_v5 = vpack.c.bf16 %v2311_v4, %v2306_v3  ;;  %v2080_v6 = vld [vmem:[#allocation5 + $0x10] sm:$0xff]   ;;  %v2321_v8 = vshrl.u32 %v61_v7, 7  ;;  %v2081_v10 = vld [vmem:[#allocation5 + $0x18] sm:$0xff]   ;;  %v60_v11 = vunpack.c.l.bf16 %v59_v9  ;;  %s2231_s23 = smov 120   ;;  %s2232_s24 = smov 104   ;;  %vm215_vm2 = vcmask 64512  }
  0x2b   :  { %1941 = vmatpush3.bf16.msra.mxu0 %v2078_v1  ;;  %1949 = vmatpush3.bf16.msra.mxu1 %v2080_v6  ;;  %s2233_s25 = smov 96   ;;  %v822_v38 = vld [vmem:[#allocation2] sm:$0xff]  ;;  %v823_v39 = vld [vmem:[#allocation2 + $0x8] sm:$0xff]  ;;  %s2234_s26 = smov 32  }
  0x2c   :  { %1942 = vmatprep.subr.bf16.mxu0 %v2228_v0  ;;  %1950 = vmatprep.subr.bf16.mxu1 %v2228_v0  ;;  %v63_v12 = vsub.s32 0, %v2321_v8  ;;  %vm824_vm3 = vcmp.ne.s32.totalorder %v822_v38, 0  ;;  %vm825_vm4 = vcmp.ne.s32.totalorder %v823_v39, 0 }
  0x2d   :  { %v826_v40 = vsel %vm824_vm3, -1e+30, %v2228_v0  ;;  %v827_v44 = vsel %vm825_vm4, -1e+30, %v2228_v0 }
  0x2e   :  { %v64_v13 = vrot.slane %v60_v11, %v63_v12 }
  0x2f   :  { %1943 = vmatpush3.bf16.msra.mxu0 %v2079_v2  ;;  %1951 = vmatpush3.bf16.msra.mxu1 %v2081_v10 }
  0x30   :  { %1966 = vmatprep.subr.mxu0 %v2228_v0  ;;  %1956 = vmatprep.subr.mxu1 %v2228_v0 }
  0x32   :  { %1945 = vmatmul.mubr.msk.bf16.vlgmr.msra.gmra.mrb[0].mxu0 %vm77_vm1, %v54_v5  ;;  %1953 = vmatmul.mubr.msk.bf16.vlgmr.msra.gmra.mrb[0].mxu1 %vm77_vm1, %v54_v5 }
  0x33   :  { %1968 = vmatprep.mubr.msk.f32.mxu0 %vm2229_vm0, %v2228_v0  ;;  %1958 = vmatprep.mubr.msk.f32.mxu1 %vm2229_vm0, %v2228_v0 }
 0x105   :  { %v115_v14 = vpop.f32.mrb[0].mxu0  ;;  %v2346_v28 = vpop.f32.mrb[0].mxu1 }
 0x106   :  { %v116_v15 = vadd.f32 %v115_v14, %v64_v13  ;;  %v1946_v16 = vpop.f32.mrb[1].mxu0  ;;  %v1954_v29 = vpop.f32.mrb[1].mxu1 }
 0x107   :  { %v118_v17 = vpop.f32.mrb[2].mxu0  ;;  %v2348_v30 = vpop.f32.mrb[2].mxu1 }
 0x108   :  { %185 = vrot.lane.b32.xlu1 %v116_v15, %s2230_s0  ;;  %180 = vrot.lane.b32.xlu0 %v116_v15, %s2231_s23  ;;  %v1947_v18 = vpop.f32.mrb[3].mxu0  ;;  %v119_v19 = vadd.f32 %v118_v17, %v64_v13  ;;  %v1955_v31 = vpop.f32.mrb[3].mxu1 }
 0x10c   :  { %187 = vrot.lane.b32.xlu1 %v119_v19, %s2230_s0  ;;  %183 = vrot.lane.b32.xlu0 %v119_v19, %s2231_s23 }
 0x110   :  { %191 = vrot.lane.b32.xlu1 %v119_v19, %s2232_s24  ;;  %189 = vrot.lane.b32.xlu0 %v116_v15, %s2232_s24 }
 0x114   :  { %290 = vrot.lane.b32.xlu1 %v119_v19, %s2233_s25  ;;  %213 = vrot.lane.b32.xlu0 %v116_v15, %s2233_s25 }
 0x17a   :  { %v186_v20 = vpop.permute.xlu1 %185  ;;  %v181_v21 = vpop.permute.xlu0 %180 }
 0x17b   :  { %366 = vrot.lane.b32.xlu0 %v181_v21, %s2233_s25 }
 0x17e   :  { %v188_v22 = vpop.permute.xlu1 %187  ;;  %v184_v23 = vpop.permute.xlu0 %183 }
 0x17f   :  { %518 = vrot.lane.b32.xlu0 %v186_v20, %s2233_s25  ;;  %442 = vrot.lane.b32.xlu1 %v184_v23, %s2233_s25 }
 0x182   :  { %v190_v24 = vpop.permute.xlu0 %189  ;;  %v192_v25 = vpop.permute.xlu1 %191 }
 0x183   :  { %594 = vrot.lane.b32.xlu1 %v188_v22, %s2233_s25  ;;  %670 = vrot.lane.b32.xlu0 %v190_v24, %s2233_s25 }
 0x186   :  { %v214_v26 = vpop.permute.xlu0 %213  ;;  %v291_v27 = vpop.permute.xlu1 %290 }
 0x187   :  { %746 = vrot.lane.b32.xlu1 %v192_v25, %s2233_s25  ;;  %1957 = vmatpush3.xpose.msk.msra.mxu1 %vm215_vm2, %v214_v26 }
 0x188   :  { %1961 = vmatprep.subr.mxu1 %v2228_v0 }
 0x18a   :  { %1959 = vmatmul.mubr.msk.f32.vlgmr.msra.gmra.mrb[4].mxu1 %vm215_vm2, %v116_v15 }
 0x18b   :  { %1962 = vmatpush3.xpose.msk.msra.mxu1 %vm215_vm2, %v291_v27  ;;  %1963 = vmatprep.mubr.msk.f32.mxu1 %vm2229_vm0, %v2228_v0 }
 0x18c   :  { %1971 = vmatprep.subr.mxu1 %v2228_v0 }
 0x18e   :  { %1964 = vmatmul.mubr.msk.f32.vlgmr.msra.gmra.mrb[6].mxu1 %vm215_vm2, %v119_v19 }
 0x18f   :  { %1973 = vmatprep.mubr.msk.f32.mxu1 %vm2229_vm0, %v2228_v0 }
 0x1ed   :  { %v367_v32 = vpop.permute.xlu0 %366 }
 0x1ee   :  { %1967 = vmatpush3.xpose.msk.msra.mxu0 %vm215_vm2, %v367_v32 }
 0x1ef   :  { %1976 = vmatprep.subr.mxu0 %v2228_v0 }
 0x1f1   :  { %v443_v33 = vpop.permute.xlu1 %442  ;;  %1969 = vmatmul.mubr.msk.f32.vlgmr.msra.gmra.mrb[4].mxu0 %vm215_vm2, %v181_v21  ;;  %v519_v34 = vpop.permute.xlu0 %518 }
 0x1f2   :  { %1972 = vmatpush3.xpose.msk.msra.mxu1 %vm215_vm2, %v443_v33  ;;  %1977 = vmatpush3.xpose.msk.msra.mxu0 %vm215_vm2, %v519_v34 }
 0x1f3   :  { %1978 = vmatprep.mubr.msk.f32.mxu0 %vm2229_vm0, %v2228_v0  ;;  %1981 = vmatprep.subr.mxu1 %v2228_v0 }
 0x1f4   :  { %1986 = vmatprep.subr.mxu0 %v2228_v0 }
 0x1f5   :  { %v595_v35 = vpop.permute.xlu1 %594  ;;  %1974 = vmatmul.mubr.msk.f32.vlgmr.msra.gmra.mrb[8].mxu1 %vm215_vm2, %v184_v23  ;;  %1979 = vmatmul.mubr.msk.f32.vlgmr.msra.gmra.mrb[6].mxu0 %vm215_vm2, %v186_v20  ;;  %v671_v36 = vpop.permute.xlu0 %670 }
 0x1f6   :  { %1982 = vmatpush3.xpose.msk.msra.mxu1 %vm215_vm2, %v595_v35  ;;  %1987 = vmatpush3.xpose.msk.msra.mxu0 %vm215_vm2, %v671_v36 }
 0x1f7   :  { %1983 = vmatprep.mubr.msk.f32.mxu1 %vm2229_vm0, %v2228_v0  ;;  %1988 = vmatprep.mubr.msk.f32.mxu0 %vm2229_vm0, %v2228_v0 }
 0x1f8   :  { %1991 = vmatprep.subr.mxu1 %v2228_v0  ;;  %1996 = vmatprep.subr.mxu0 %v2228_v0 }
 0x1f9   :  { %v747_v37 = vpop.permute.xlu1 %746  ;;  %1984 = vmatmul.mubr.msk.f32.vlgmr.msra.gmra.mrb[10].mxu1 %vm215_vm2, %v188_v22  ;;  %1989 = vmatmul.mubr.msk.f32.vlgmr.msra.gmra.mrb[8].mxu0 %vm215_vm2, %v190_v24 }
 0x1fa   :  { %1992 = vmatpush3.xpose.msk.msra.mxu1 %vm215_vm2, %v747_v37  ;;  %1993 = vmatprep.mubr.msk.f32.mxu1 %vm2229_vm0, %v2228_v0 }
 0x1fb   :  { %2001 = vmatprep.subr.mxu1 %v2228_v0  ;;  %1997 = vmatpush3.msra.mxu0 %v2346_v28 }
 0x1fc   :  { %1998 = vmatprep.mubr.msk.f32.mxu0 %vm2229_vm0, %v2228_v0  ;;  %2006 = vmatprep.subr.mxu0 %v2228_v0 }
 0x1fd   :  { %1994 = vmatmul.mubr.msk.f32.vlgmr.msra.gmra.mrb[12].mxu1 %vm215_vm2, %v192_v25 }
 0x1fe   :  { %2002 = vmatpush3.msra.mxu1 %v2348_v30  ;;  %2003 = vmatprep.mubr.msk.f32.mxu1 %vm2229_vm0, %v2228_v0 }
 0x1ff   :  { %2011 = vmatprep.subr.mxu1 %v2228_v0 }
 0x25d   :  { %v286_v41 = vpop.f32.mrb[4].mxu1 }
 0x25e   :  { %v828_v42 = vadd.f32 %v826_v40, %v286_v41  ;;  %v1960_v43 = vpop.f32.mrb[5].mxu1 }
 0x260   :  { %v836_v45 = vsel %vm215_vm2, %v828_v42, -inf }
 0x261   :  { %837 = vmax.xlane.f32.xlu0 %v836_v45  ;;  %v362_v46 = vpop.f32.mrb[6].mxu1 }
 0x262   :  { %v829_v47 = vadd.f32 %v827_v44, %v362_v46  ;;  %v1965_v48 = vpop.f32.mrb[7].mxu1 }
 0x264   :  { %v839_v49 = vsel %vm215_vm2, %v829_v47, -inf }
 0x265   :  { %840 = vmax.xlane.f32.xlu1 %v839_v49 }
 0x2c4   :  { %v438_v50 = vpop.f32.mrb[4].mxu0 }
 0x2c5   :  { %v830_v51 = vadd.f32 %v826_v40, %v438_v50  ;;  %v1970_v52 = vpop.f32.mrb[5].mxu0 }
 0x2c7   :  { %v842_v53 = vsel %vm215_vm2, %v830_v51, -inf }
 0x2c8   :  { %v514_v54 = vpop.f32.mrb[8].mxu1  ;;  %843 = vmax.xlane.f32.xlu0 %v842_v53  ;;  %v590_v55 = vpop.f32.mrb[6].mxu0 }
 0x2c9   :  { %v831_v56 = vadd.f32 %v827_v44, %v514_v54  ;;  %v832_v57 = vadd.f32 %v826_v40, %v590_v55  ;;  %v1975_v58 = vpop.f32.mrb[9].mxu1  ;;  %v1980_v59 = vpop.f32.mrb[7].mxu0 }
 0x2cb   :  { %v845_v60 = vsel %vm215_vm2, %v831_v56, -inf  ;;  %v848_v61 = vsel %vm215_vm2, %v832_v57, -inf }
 0x2cc   :  { %v666_v62 = vpop.f32.mrb[10].mxu1  ;;  %846 = vmax.xlane.f32.xlu0 %v845_v60  ;;  %849 = vmax.xlane.f32.xlu1 %v848_v61  ;;  %v742_v63 = vpop.f32.mrb[8].mxu0 }
 0x2cd   :  { %v833_v1 = vadd.f32 %v827_v44, %v666_v62  ;;  %v834_v2 = vadd.f32 %v826_v40, %v742_v63  ;;  %v1985_v5 = vpop.f32.mrb[11].mxu1  ;;  %v1990_v6 = vpop.f32.mrb[9].mxu0 }
 0x2cf   :  { %v851_v7 = vsel %vm215_vm2, %v833_v1, -inf  ;;  %v854_v9 = vsel %vm215_vm2, %v834_v2, -inf }
 0x2d0   :  { %v818_v10 = vpop.f32.mrb[12].mxu1  ;;  %852 = vmax.xlane.f32.xlu0 %v851_v7  ;;  %855 = vmax.xlane.f32.xlu1 %v854_v9 }
 0x2d1   :  { %v835_v11 = vadd.f32 %v827_v44, %v818_v10  ;;  %v1995_v12 = vpop.f32.mrb[13].mxu1 }
 0x2d3   :  { %v857_v13 = vsel %vm215_vm2, %v835_v11, -inf }
 0x2d4   :  { %858 = vmax.xlane.f32.xlu0 %v857_v13 }
 0x2e1   :  { %194 = vrot.lane.b32.xlu1 %v2346_v28, %s2233_s25 }
 0x2e5   :  { %201 = vrot.lane.b32.xlu1 %v2346_v28, %s2226_s2 }
 0x2e9   :  { %204 = vrot.lane.b32.xlu1 %v2348_v30, %s2226_s2 }
 0x2ea   :  { %198 = vrot.lane.b32.xlu0 %v2348_v30, %s2233_s25 }
 0x2ee   :  { %v838_v16 = vpop.xlane.xlu0 %837 }
 0x2ef   :  { %v860_v17 = vsub.f32 %v828_v42, %v838_v16 }
 0x2f1   :  { %v868_v19 = vmul.f32 1.442695, %v860_v17 }
 0x2f2   :  { %v841_v14 = vpop.xlane.xlu1 %840 }
 0x2f3   :  { %v861_v15 = vsub.f32 %v829_v47, %v841_v14 }
 0x2f5   :  { %v870_v18 = vmul.f32 1.442695, %v861_v15 }
 0x2f7   :  { %2086 = vpow2.f32 %v870_v18 }
 0x2f8   :  { %2088 = vpow2.f32 %v868_v19 }
 0x301   :  { %v2087_v20 = vpop.eup %2086 }
 0x302   :  { %v887_v21 = vsel %vm215_vm2, %v2087_v20, 0.0  ;;  %v2403_v22 = vpop.eup %2088 }
 0x303   :  { %v884_v23 = vsel %vm215_vm2, %v2403_v22, 0.0 }
 0x309   :  { %888 = vadd.xlane.f32.xlu0 %v887_v21 }
 0x30d   :  { %885 = vadd.xlane.f32.xlu1 %v884_v23 }
 0x355   :  { %v844_v24 = vpop.xlane.xlu0 %843 }
 0x356   :  { %v862_v25 = vsub.f32 %v830_v51, %v844_v24 }
 0x358   :  { %v872_v26 = vmul.f32 1.442695, %v862_v25 }
 0x359   :  { %v847_v27 = vpop.xlane.xlu0 %846  ;;  %v850_v29 = vpop.xlane.xlu1 %849 }
 0x35a   :  { %2090 = vpow2.f32 %v872_v26  ;;  %v863_v31 = vsub.f32 %v831_v56, %v847_v27  ;;  %v864_v32 = vsub.f32 %v832_v57, %v850_v29 }
 0x35c   :  { %v874_v33 = vmul.f32 1.442695, %v863_v31  ;;  %v876_v34 = vmul.f32 1.442695, %v864_v32 }
 0x35d   :  { %v853_v35 = vpop.xlane.xlu0 %852  ;;  %v856_v36 = vpop.xlane.xlu1 %855 }
 0x35e   :  { %2092 = vpow2.f32 %v874_v33  ;;  %v865_v37 = vsub.f32 %v833_v1, %v853_v35  ;;  %v866_v38 = vsub.f32 %v834_v2, %v856_v36  ;;  %v1524_v33 = vld [vmem:[#allocation5 + $0x40] sm:$0x1]  ;;  %v1528_v36 = vsub.s32 1, %v2321_v8 }
 0x35f   :  { %2094 = vpow2.f32 %v876_v34  ;;  %v1525_v35 = vunpack.c.l.bf16 %v1524_v33 }
 0x360   :  { %v878_v39 = vmul.f32 1.442695, %v865_v37  ;;  %v880_v40 = vmul.f32 1.442695, %v866_v38 }
 0x361   :  { %v859_v41 = vpop.xlane.xlu0 %858  ;;  %v195_v56 = vpop.permute.xlu1 %194 }
 0x362   :  { %2096 = vpow2.f32 %v878_v39  ;;  %v867_v42 = vsub.f32 %v835_v11, %v859_v41 }
 0x363   :  { %2098 = vpow2.f32 %v880_v40 }
 0x364   :  { %v2091_v43 = vpop.eup %2090  ;;  %v882_v44 = vmul.f32 1.442695, %v867_v42 }
 0x365   :  { %v890_v45 = vsel %vm215_vm2, %v2091_v43, 0.0  ;;  %v202_v57 = vpop.permute.xlu1 %201  ;;  %v199_v58 = vpop.permute.xlu0 %198 }
 0x366   :  { %2100 = vpow2.f32 %v882_v44  ;;  %891 = vadd.xlane.f32.xlu1 %v890_v45 }
 0x368   :  { %v2093_v46 = vpop.eup %2092 }
 0x369   :  { %v2095_v47 = vpop.eup %2094  ;;  %v893_v48 = vsel %vm215_vm2, %v2093_v46, 0.0  ;;  %v205_v59 = vpop.permute.xlu1 %204 }
 0x36a   :  { %894 = vadd.xlane.f32.xlu0 %v893_v48  ;;  %v896_v49 = vsel %vm215_vm2, %v2095_v47, 0.0 }
 0x36b   :  { %897 = vadd.xlane.f32.xlu1 %v896_v49 }
 0x36c   :  { %v2410_v50 = vpop.eup %2096 }
 0x36d   :  { %v2412_v51 = vpop.eup %2098  ;;  %v899_v52 = vsel %vm215_vm2, %v2410_v50, 0.0 }
 0x36e   :  { %900 = vadd.xlane.f32.xlu0 %v899_v52  ;;  %v902_v53 = vsel %vm215_vm2, %v2412_v51, 0.0 }
 0x36f   :  { %903 = vadd.xlane.f32.xlu1 %v902_v53 }
 0x370   :  { %v2418_v54 = vpop.eup %2100 }
 0x371   :  { %v905_v55 = vsel %vm215_vm2, %v2418_v54, 0.0 }
 0x372   :  { %906 = vadd.xlane.f32.xlu0 %v905_v55 }
 0x380   :  { %210 = vrot.lane.b32.xlu1 %v2348_v30, %s2234_s26 }
 0x388   :  { %207 = vrot.lane.b32.xlu0 %v2346_v28, %s2234_s26 }
 0x396   :  { %v889_v60 = vpop.xlane.xlu0 %888 }
 0x397   :  { %2102 = vrcp.f32 %v889_v60 }
 0x39a   :  { %v886_v61 = vpop.xlane.xlu1 %885 }
 0x39b   :  { %2104 = vrcp.f32 %v886_v61 }
 0x3a1   :  { %v2103_v62 = vpop.eup %2102 }
 0x3a2   :  { %v917_v63 = vmul.f32 %v2103_v62, %v2087_v20 }
 0x3a4   :  { %925 = vst.msk [vmem:[#allocation8 + $0x8] sm:$0xff] %vm215_vm2, %v917_v63  ;;  %2004 = vmatmul.mubr.msk.f32.vlgmr.msra.gmra.mrb[14].mxu1 %vm215_vm2, %v917_v63 }
 0x3a5   :  { %v2105_v1 = vpop.eup %2104  ;;  %2012 = vmatpush3.msra.mxu1 %v199_v58  ;;  %2013 = vmatprep.mubr.msk.f32.mxu1 %vm2229_vm0, %v2228_v0  ;;  %v52_v58 = vld [vmem:[%s2542_s1] sm:$0xff] }
 0x3a6   :  { %v916_v28 = vmul.f32 %v2105_v1, %v2403_v22  ;;  %2021 = vmatprep.subr.mxu1 %v2228_v0 }
 0x3a8   :  { %924 = vst.msk [vmem:[#allocation8] sm:$0xff] %vm215_vm2, %v916_v28  ;;  %1999 = vmatmul.mubr.msk.f32.vlgmr.msra.gmra.mrb[10].mxu0 %vm215_vm2, %v916_v28 }
 0x3a9   :  { %2007 = vmatpush3.msra.mxu0 %v195_v56  ;;  %2008 = vmatprep.mubr.msk.f32.mxu0 %vm2229_vm0, %v2228_v0 }
 0x3aa   :  { %2016 = vmatprep.subr.mxu0 %v2228_v0 }
 0x3f3   :  { %v892_v30 = vpop.xlane.xlu1 %891 }
 0x3f4   :  { %2106 = vrcp.f32 %v892_v30 }
 0x3f7   :  { %v895_v2 = vpop.xlane.xlu0 %894 }
 0x3f8   :  { %2108 = vrcp.f32 %v895_v2  ;;  %v898_v5 = vpop.xlane.xlu1 %897 }
 0x3f9   :  { %2110 = vrcp.f32 %v898_v5  ;;  %v53_v5 = vld [vmem:[%s2542_s1 + $0x8] sm:$0xff]  ;;  %s2236_s1 = smov [#allocation8]  }
 0x3fa   :  { %s1839_s8 = sshll.u32 %s2236_s1, 4  ;;  %s1840_s8 = int_to_ptr.vmem [resolvable:$true] %s1839_s8 }
 0x3fb   :  { %v901_v6 = vpop.xlane.xlu0 %900  ;;  %s2170_s9 = scalar_lea.vmem %s1840_s8, 1024  ;;  %p2175_p3 = scmp.lt.s32.totalorder %s1840_s8, %s1840_s8 }
 0x3fc   :  { %2112 = vrcp.f32 %v901_v6  ;;  %v904_v7 = vpop.xlane.xlu1 %903  ;;  %v2082_v6 = vld [vmem:[#allocation5 + $0x20] sm:$0xff]   ;;  %p2171_p2 = scmp.ne.s32.totalorder %s1840_s8, %s2170_s9  ;;  %p2176_p4 = scmp.lt.s32.totalorder %s2170_s9, %s2170_s9 }
 0x3fd   :  { %2114 = vrcp.f32 %v904_v7  ;;  %v2083_v7 = vld [vmem:[#allocation5 + $0x28] sm:$0xff]  }
 0x3fe   :  { %v2107_v9 = vpop.eup %2106  ;;  %p2177_p5 = por %p2176_p4, %p2175_p3 }
 0x3ff   :  { %v918_v10 = vmul.f32 %v2107_v9, %v2091_v43  ;;  %v907_v11 = vpop.xlane.xlu0 %906  ;;  %v1529_v43 = vrot.slane %v1525_v35, %v1528_v36  ;;  %v2084_v36 = vld [vmem:[#allocation5 + $0x30] sm:$0xff]  }
 0x400   :  { %2116 = vrcp.f32 %v907_v11  ;;  %v211_v21 = vpop.permute.xlu1 %210  ;;  %p2178_p6 = pnand %p2177_p5, %p2171_p2 }
 0x401   :  { %926 = vst.msk [vmem:[#allocation8 + $0x10] sm:$0xff] %vm215_vm2, %v918_v10  ;;  %2009 = vmatmul.mubr.msk.f32.vlgmr.msra.gmra.mrb[12].mxu0 %vm215_vm2, %v918_v10 }
 0x402   :  { %v2109_v12 = vpop.eup %2108  ;;  %2017 = vmatpush3.msra.mxu0 %v202_v57  ;;  %2018 = vmatprep.mubr.msk.f32.mxu0 %vm2229_vm0, %v2228_v0 }
 0x403   :  { %v2111_v13 = vpop.eup %2110  ;;  %v919_v14 = vmul.f32 %v2109_v12, %v2093_v46  ;;  %2026 = vmatprep.subr.mxu0 %v2228_v0  ;;  %v208_v16 = vpop.permute.xlu0 %207 }
 0x404   :  { %v920_v15 = vmul.f32 %v2111_v13, %v2095_v47 }
 0x405   :  { %927 = vst.msk [vmem:[#allocation8 + $0x18] sm:$0xff] %vm215_vm2, %v919_v14  ;;  %2014 = vmatmul.mubr.msk.f32.vlgmr.msra.gmra.mrb[16].mxu1 %vm215_vm2, %v919_v14 }
 0x406   :  { %v2113_v17 = vpop.eup %2112  ;;  %928 = vst.msk [vmem:[#allocation8 + $0x20] sm:$0xff] %vm215_vm2, %v920_v15  ;;  %2019 = vmatmul.mubr.msk.f32.vlgmr.msra.gmra.mrb[14].mxu0 %vm215_vm2, %v920_v15  ;;  %2022 = vmatpush3.msra.mxu1 %v205_v59  ;;  %v2235_v59 = vmov 0   ;;  %v1534_v15 = vld [vmem:[#allocation5 + $0x40] sm:$0x2] }
 0x407   :  { %v2115_v18 = vpop.eup %2114  ;;  %v921_v19 = vmul.f32 %v2113_v17, %v2410_v50  ;;  %2027 = vmatpush3.msra.mxu0 %v208_v16  ;;  %2023 = vmatprep.mubr.msk.f32.mxu1 %vm2229_vm0, %v2228_v0  ;;  %v1535_v16 = vunpack.c.l.bf16 %v1534_v15  ;;  %v1565_v17 = vsub.s32 2, %v2321_v8 }
 0x408   :  { %v922_v20 = vmul.f32 %v2115_v18, %v2412_v51  ;;  %2028 = vmatprep.mubr.msk.f32.mxu0 %vm2229_vm0, %v2228_v0  ;;  %2031 = vmatprep.subr.mxu1 %v2228_v0 }
 0x409   :  { %929 = vst.msk [vmem:[#allocation8 + $0x28] sm:$0xff] %vm215_vm2, %v921_v19  ;;  %2024 = vmatmul.mubr.msk.f32.vlgmr.msra.gmra.mrb[18].mxu1 %vm215_vm2, %v921_v19  ;;  %2036 = vmatprep.subr.bf16.mxu0 %v2228_v0  ;;  %v1566_v18 = vrot.slane %v1535_v16, %v1565_v17  ;;  %v1571_v19 = vsub.s32 3, %v2321_v8 }
 0x40a   :  { %v2117_v22 = vpop.eup %2116  ;;  %930 = vst.msk [vmem:[#allocation8 + $0x30] sm:$0xff] %vm215_vm2, %v922_v20  ;;  %2029 = vmatmul.mubr.msk.f32.vlgmr.msra.gmra.mrb[16].mxu0 %vm215_vm2, %v922_v20  ;;  %2032 = vmatpush3.msra.mxu1 %v211_v21 }
 0x40b   :  { %v923_v23 = vmul.f32 %v2117_v22, %v2418_v54  ;;  %2033 = vmatprep.mubr.msk.f32.mxu1 %vm2229_vm0, %v2228_v0  ;;  %2040 = vmatprep.mubr.msk.bf16.mxu0 %vm2229_vm0, %v2228_v0  ;;  %v1572_v22 = vrot.slane %v1535_v16, %v1571_v19 }
 0x40c   :  { %2044 = vmatprep.subr.bf16.mxu1 %v2228_v0  ;;  %2076 = vset.pattern.permute.xlu1 %v2235_v59 }
 0x40d   :  { %931 = vst.msk [vmem:[#allocation8 + $0x38] sm:$0xff] %vm215_vm2, %v923_v23  ;;  %2034 = vmatmul.mubr.msk.f32.vlgmr.msra.gmra.mrb[20].mxu1 %vm215_vm2, %v923_v23  ;;  %2077 = vset.pattern.permute.xlu0 %v2235_v59 }
 0x40e   :  { %2048 = vmatprep.mubr.msk.bf16.mxu1 %vm2229_vm0, %v2228_v0  ;;  %2037 = vmatpush3.bf16.msra.mxu0 %v2082_v6 }
 0x40f   :  { %2038 = vmatprep.subr.bf16.mxu0 %v2228_v0 }
 0x412   :  { %2039 = vmatpush3.bf16.msra.mxu0 %v2083_v7 }
 0x413   :  { %2052 = vmatprep.subr.bf16.mxu0 %v2228_v0 }
 0x477   :  { %v1074_v24 = vpop.f32.mrb[14].mxu1 }
 0x478   :  { %v2005_v25 = vpop.f32.mrb[15].mxu1 }
 0x47b   :  { %v1001_v26 = vpop.f32.mrb[10].mxu0 }
 0x47c   :  { %v2000_v27 = vpop.f32.mrb[11].mxu0 }
 0x4d4   :  { %v1147_v29 = vpop.f32.mrb[12].mxu0 }
 0x4d5   :  { %v1517_v31 = vadd.f32 %v1147_v29, %v1001_v26  ;;  %v2010_v32 = vpop.f32.mrb[13].mxu0 }
 0x4d8   :  { %v1220_v34 = vpop.f32.mrb[16].mxu1 }
 0x4d9   :  { %v1521_v37 = vadd.f32 %v1220_v34, %v1074_v24  ;;  %v1293_v38 = vpop.f32.mrb[14].mxu0  ;;  %v2015_v39 = vpop.f32.mrb[17].mxu1 }
 0x4da   :  { %v1518_v40 = vadd.f32 %v1517_v31, %v1293_v38  ;;  %v2020_v41 = vpop.f32.mrb[15].mxu0  ;;  %v1592_v39 = vld [vmem:[#allocation5 + $0x40] sm:$0x4] }
 0x4db   :  { %v1593_v41 = vunpack.c.l.bf16 %v1592_v39 }
 0x4dc   :  { %v1366_v42 = vpop.f32.mrb[18].mxu1 }
 0x4dd   :  { %v1522_v44 = vadd.f32 %v1521_v37, %v1366_v42  ;;  %v1439_v45 = vpop.f32.mrb[16].mxu0  ;;  %v2025_v46 = vpop.f32.mrb[19].mxu1  ;;  %v2085_v37 = vld [vmem:[#allocation5 + $0x38] sm:$0xff]   ;;  %v1596_v42 = vsub.s32 4, %v2321_v8 }
 0x4de   :  { %v1519_v47 = vadd.f32 %v1518_v40, %v1439_v45  ;;  %v2030_v48 = vpop.f32.mrb[17].mxu0 }
 0x4e0   :  { %v1530_v49 = vadd.f32 %v1529_v43, %v1519_v47  ;;  %v1512_v50 = vpop.f32.mrb[20].mxu1 }
 0x4e1   :  { %v1523_v51 = vadd.f32 %v1522_v44, %v1512_v50  ;;  %v2035_v52 = vpop.f32.mrb[21].mxu1 }
 0x4e2   :  { %v1532_v53 = vadd.f32 %v1530_v49, %v2306_v3 }
 0x4e3   :  { %v1531_v54 = vadd.f32 %v1529_v43, %v1523_v51  ;;  %v1597_v43 = vrot.slane %v1593_v41, %v1596_v42 }
 0x4e4   :  { %v1536_v55 = vsel %vm77_vm1, %v1532_v53, 0.0 }
 0x4e5   :  { %1537 = vadd.xlane.f32.xlu0 %v1536_v55  ;;  %v1533_v56 = vadd.f32 %v1531_v54, %v2311_v4 }
 0x4e7   :  { %v1539_v57 = vsel %vm77_vm1, %v1533_v56, 0.0 }
 0x4e8   :  { %1540 = vadd.xlane.f32.xlu1 %v1539_v57  ;;  %v1772_v57 = vsub.s32 5, %v2321_v8 }
 0x4f9   :  { %1577 = vperm.xlu1 %2076, %v52_v58   ;;  %v1773_v58 = vrot.slane %v1593_v41, %v1772_v57 }
 0x4fd   :  { %1674 = vrot.lane.b32.xlu1 %v2084_v36, %s2233_s25 }
 0x501   :  { %1676 = vrot.lane.b32.xlu1 %v2085_v37, %s2233_s25 }
 0x572   :  { %v1538_v60 = vpop.xlane.xlu0 %1537 }
 0x573   :  { %v1543_v61 = vmul.f32 0.03125, %v1538_v60 }
 0x575   :  { %v1545_v3 = vsub.f32 %v1532_v53, %v1543_v61  ;;  %v1541_v62 = vpop.xlane.xlu1 %1540 }
 0x576   :  { %v1544_v63 = vmul.f32 0.03125, %v1541_v62 }
 0x577   :  { %v1547_v1 = vmul.f32 %v1545_v3, %v1545_v3 }
 0x578   :  { %v1546_v28 = vsub.f32 %v1533_v56, %v1544_v63 }
 0x579   :  { %v1549_v4 = vsel %vm77_vm1, %v1547_v1, 0.0  ;;  %v2483_v29 = vpop.permute.xlu1 %1577 }
 0x57a   :  { %1550 = vadd.xlane.f32.xlu0 %v1549_v4  ;;  %v1548_v30 = vmul.f32 %v1546_v28, %v1546_v28 }
 0x57c   :  { %v1552_v2 = vsel %vm77_vm1, %v1548_v30, 0.0 }
 0x57d   :  { %v1675_v38 = vpop.permute.xlu1 %1674 }
 0x57e   :  { %1553 = vadd.xlane.f32.xlu0 %v1552_v2  ;;  %2045 = vmatpush3.bf16.msra.mxu1 %v1675_v38 }
 0x57f   :  { %2046 = vmatprep.subr.bf16.mxu1 %v2228_v0 }
 0x581   :  { %v1677_v40 = vpop.permute.xlu1 %1676 }
 0x582   :  { %2047 = vmatpush3.bf16.msra.mxu1 %v1677_v40 }
 0x594   :  { %1582 = vperm.xlu0 %2077, %v53_v5  }
 0x607   :  { %v1551_v9 = vpop.xlane.xlu0 %1550 }
 0x608   :  { %v1555_v10 = vmul.f32 0.03125, %v1551_v9 }
 0x60a   :  { %v1557_v11 = vadd.f32 1e-05, %v1555_v10 }
 0x60b   :  { %v1554_v12 = vpop.xlane.xlu0 %1553 }
 0x60c   :  { %2118 = vrsqrt.f32 %v1557_v11  ;;  %v1556_v13 = vmul.f32 0.03125, %v1554_v12 }
 0x60e   :  { %v1558_v14 = vadd.f32 1e-05, %v1556_v13 }
 0x610   :  { %2120 = vrsqrt.f32 %v1558_v14 }
 0x613   :  { %v2485_v31 = vpop.permute.xlu0 %1582 }
 0x616   :  { %v2119_v20 = vpop.eup %2118 }
 0x617   :  { %v1561_v21 = vmul.f32 %v2119_v20, %v1545_v3 }
 0x619   :  { %v1567_v23 = vmul.f32 %v1566_v18, %v1561_v21 }
 0x61a   :  { %v2121_v24 = vpop.eup %2120 }
 0x61b   :  { %v1562_v25 = vmul.f32 %v2121_v24, %v1546_v28  ;;  %v1573_v26 = vadd.f32 %v1572_v22, %v1567_v23 }
 0x61d   :  { %v1568_v27 = vmul.f32 %v1566_v18, %v1562_v25  ;;  %v1585_v33 = vmul.f32 %v2483_v29, %v1573_v26 }
 0x61f   :  { %v1574_v32 = vadd.f32 %v1572_v22, %v1568_v27 }
 0x621   :  { %v1586_v34 = vmul.f32 %v2485_v31, %v1574_v32 }
 0x623   :  { %v1587_v35 = vpack.c.bf16 %v1586_v34, %v1585_v33 }
 0x625   :  { %2041 = vmatmul.mubr.msk.bf16.vlgmr.msra.gmra.mrb[20].mxu0 %vm77_vm1, %v1587_v35 }
 0x626   :  { %2056 = vmatprep.mubr.msk.bf16.mxu0 %vm2229_vm0, %v2228_v0  ;;  %2053 = vmatpush3.bf16.msra.mxu0 %v2084_v36 }
 0x627   :  { %2054 = vmatprep.subr.bf16.mxu0 %v2228_v0 }
 0x62a   :  { %2055 = vmatpush3.bf16.msra.mxu0 %v2085_v37 }
 0x6f8   :  { %v1647_v44 = vpop.f32.mrb[20].mxu0 }
 0x6f9   :  { %v1648_v45 = vadd.f32 %v1647_v44, %v1597_v43  ;;  %v2042_v46 = vpop.f32.mrb[21].mxu0 }
 0x6fa   :  { %v1650_v47 = vpop.f32.mrb[22].mxu0 }
 0x6fb   :  { %v1651_v48 = vadd.f32 %v1650_v47, %v1597_v43  ;;  %v2043_v49 = vpop.f32.mrb[23].mxu0  ;;  %v1654_v50 = vmax.f32 %v1648_v45, 0.0 }
 0x6fd   :  { %v1655_v51 = vmax.f32 %v1651_v48, 0.0 }
 0x6ff   :  { %v1656_v52 = vpack.c.bf16 %v1655_v51, %v1654_v50 }
 0x701   :  { %1662 = vrot.lane.b32.xlu1 %v1656_v52, %s2233_s25  ;;  %2057 = vmatmul.mubr.msk.bf16.vlgmr.msra.gmra.mrb[24].mxu0 %vm77_vm1, %v1656_v52 }
 0x773   :  { %v1663_v0 = vpop.permute.xlu1 %1662 }
 0x774   :  { %2049 = vmatmul.mubr.msk.bf16.vlgmr.msra.gmra.mrb[24].mxu1 %vm77_vm1, %v1663_v0 }
 0x7d4   :  { %v1763_v53 = vpop.f32.mrb[24].mxu0 }
 0x7d5   :  { %v2058_v54 = vpop.f32.mrb[25].mxu0 }
 0x7d6   :  { %v1766_v55 = vpop.f32.mrb[26].mxu0 }
 0x7d7   :  { %v2059_v56 = vpop.f32.mrb[27].mxu0 }
 0x847   :  { %v1717_v59 = vpop.f32.mrb[24].mxu1 }
 0x848   :  { %v1764_v60 = vadd.f32 %v1763_v53, %v1717_v59  ;;  %v2050_v61 = vpop.f32.mrb[25].mxu1 }
 0x849   :  { %v1720_v3 = vpop.f32.mrb[26].mxu1 }
 0x84a   :  { %v1774_v62 = vadd.f32 %v1773_v58, %v1764_v60  ;;  %v1767_v63 = vadd.f32 %v1766_v55, %v1720_v3  ;;  %v2051_v1 = vpop.f32.mrb[27].mxu1 }
 0x84c   :  { %v1775_v28 = vadd.f32 %v1773_v58, %v1767_v63  ;;  %v1776_v4 = vadd.f32 %v1774_v62, %v1585_v33 }
 0x84e   :  { %v1780_v30 = vsel %vm77_vm1, %v1776_v4, 0.0  ;;  %v1777_v2 = vadd.f32 %v1775_v28, %v1586_v34 }
 0x84f   :  { %1781 = vadd.xlane.f32.xlu1 %v1780_v30 }
 0x850   :  { %v1783_v5 = vsel %vm77_vm1, %v1777_v2, 0.0 }
 0x851   :  { %1784 = vadd.xlane.f32.xlu0 %v1783_v5 }
 0x8dc   :  { %v1782_v6 = vpop.xlane.xlu1 %1781 }
 0x8dd   :  { %v1786_v7 = vmul.f32 0.03125, %v1782_v6 }
 0x8de   :  { %v1785_v9 = vpop.xlane.xlu0 %1784 }
 0x8df   :  { %v1788_v10 = vsub.f32 %v1776_v4, %v1786_v7  ;;  %v1787_v11 = vmul.f32 0.03125, %v1785_v9 }
 0x8e1   :  { %v1789_v12 = vsub.f32 %v1777_v2, %v1787_v11  ;;  %v1790_v13 = vmul.f32 %v1788_v10, %v1788_v10 }
 0x8e3   :  { %v1792_v14 = vsel %vm77_vm1, %v1790_v13, 0.0  ;;  %v1791_v15 = vmul.f32 %v1789_v12, %v1789_v12 }
 0x8e4   :  { %1793 = vadd.xlane.f32.xlu1 %v1792_v14 }
 0x8e5   :  { %v1795_v16 = vsel %vm77_vm1, %v1791_v15, 0.0 }
 0x8e8   :  { %1796 = vadd.xlane.f32.xlu1 %v1795_v16 }
 0x8e9   :  { %2181 = shalt.err (!%p2178_p6)
}
 0x8ea   :  { %s2182_s12 = scalar_lea.hbm %s2546_s5, 1024 }
 0x8eb   :  { %p2183_p7 = scmp.ne.s32.totalorder %s2546_s5, %s2182_s12  ;;  %p2186_p8 = scmp.lt.u32.totalorder %s2182_s12, %s2546_s5 }
 0x8ed   :  { %p2188_p9 = pnand %p2186_p8, %p2183_p7 }
 0x8ef   :  { %2191 = shalt.err (!%p2188_p9)
}
 0x8f0   :  { %1845 = dma.vmem_to_hbm [thread:$0]  %s1840_s8, 1024, %s2546_s5, [#allocation9], %s2223_s28, %s2223_s28, %s2224_s29   ;;  %v1778_v23 = vld [vmem:[#allocation5 + $0x40] sm:$0x8]  ;;  %v1808_v25 = vsub.s32 6, %v2321_v8  ;;  %v1814_v26 = vsub.s32 7, %v2321_v8 }
 0x8f1   :  { %v1779_v24 = vunpack.c.l.bf16 %v1778_v23  ;;  %s2237_s5 = smov [#allocation7]  }
 0x8f2   :  { %s1827_s18 = sshll.u32 %s2237_s5, 4  ;;  %s1828_s18 = int_to_ptr.vmem [resolvable:$true] %s1827_s18 }
 0x8f3   :  { %v1809_v27 = vrot.slane %v1779_v24, %v1808_v25  ;;  %v1815_v34 = vrot.slane %v1779_v24, %v1814_v26  ;;  %s2192_s19 = scalar_lea.vmem %s1828_s18, 256  ;;  %p2197_p11 = scmp.lt.s32.totalorder %s1828_s18, %s1828_s18 }
 0x8f4   :  { %p2193_p10 = scmp.ne.s32.totalorder %s1828_s18, %s2192_s19  ;;  %p2198_p12 = scmp.lt.s32.totalorder %s2192_s19, %s2192_s19 }
 0x8f6   :  { %p2199_p13 = por %p2198_p12, %p2197_p11 }
 0x8f8   :  { %p2200_p0 = pnand %p2199_p13, %p2193_p10 }
 0x971   :  { %v1794_v17 = vpop.xlane.xlu1 %1793 }
 0x972   :  { %v1798_v18 = vmul.f32 0.03125, %v1794_v17 }
 0x974   :  { %v1800_v19 = vadd.f32 1e-05, %v1798_v18 }
 0x975   :  { %v1797_v20 = vpop.xlane.xlu1 %1796 }
 0x976   :  { %2122 = vrsqrt.f32 %v1800_v19  ;;  %v1799_v21 = vmul.f32 0.03125, %v1797_v20 }
 0x978   :  { %v1801_v22 = vadd.f32 1e-05, %v1799_v21 }
 0x97a   :  { %2124 = vrsqrt.f32 %v1801_v22 }
 0x980   :  { %v2123_v32 = vpop.eup %2122 }
 0x981   :  { %v1804_v33 = vmul.f32 %v2123_v32, %v1788_v10 }
 0x983   :  { %v1810_v35 = vmul.f32 %v1809_v27, %v1804_v33 }
 0x984   :  { %v2125_v36 = vpop.eup %2124 }
 0x985   :  { %v1805_v37 = vmul.f32 %v2125_v36, %v1789_v12  ;;  %v1816_v38 = vadd.f32 %v1815_v34, %v1810_v35 }
 0x987   :  { %v1811_v39 = vmul.f32 %v1809_v27, %v1805_v37  ;;  %v1818_v40 = vmul.f32 %v1816_v38, %v2483_v29 }
 0x989   :  { %v1817_v41 = vadd.f32 %v1815_v34, %v1811_v39  ;;  %1820 = vst.msk [vmem:[#allocation7] sm:$0xff] %vm77_vm1, %v1818_v40 }
 0x98b   :  { %v1819_v42 = vmul.f32 %v1817_v41, %v2485_v31 }
 0x98d   :  { %1821 = vst.msk [vmem:[#allocation7 + $0x8] sm:$0xff] %vm77_vm1, %v1819_v42 }
 0x98e   :  { %2203 = shalt.err (!%p2200_p0)
}
 0x98f   :  { %s2204_s21 = scalar_lea.hbm %s2545_s4, 256 }
 0x990   :  { %p2205_p1 = scmp.ne.s32.totalorder %s2545_s4, %s2204_s21  ;;  %p2208_p2 = scmp.lt.u32.totalorder %s2204_s21, %s2545_s4 }
 0x992   :  { %p2210_p3 = pnand %p2208_p2, %p2205_p1 }
 0x994   :  { %2213 = shalt.err (!%p2210_p3)
}
 0x995   :  { %1833 = dma.vmem_to_hbm [thread:$0]  %s1828_s18, 256, %s2545_s4, [#allocation4], %s2223_s28, %s2223_s28, %s2224_s29  }
 0x996   :  { %2218 = dma.done.wait [#allocation4], 256  }
 0x997   :  { %2219 = vsyncadd [#allocation4], 4294967040 }
 0x998   :  { %2220 = dma.done.wait [#allocation9], 1024  }
 0x999   :  { %2221 = vsyncadd [#allocation9], 4294966272 }
 0x99a   :  { %1852 = vsyncpa [#allocation3], 1 }
 0x99b   :  { %1853 = vsyncpa [#allocation6], 1 }
 0x99c   :  { %1854 = vsyncpa [#allocation4], 1 }
 0x99d   :  { %1855 = vsyncpa [#allocation9], 1 }

</bundles_post_ra>
